<compile_context>
chip_gen: v7x
topology: tpu7x:2x2x1
jax: 0.10.0
libtpu: 0.0.40
codegen_flags: <defaults>
</compile_context>

<pallas_src>
import functools
import math

import numpy as np
import jax
import jax.numpy as jnp
from jax.experimental import pallas as pl
from jax.experimental.pallas import tpu as pltpu


def _round_up(v, m):
    return (v + m - 1) // m * m


# ----------------------------- Pallas kernel ------------------------------ #

def _conv1d_kernel(w_ref, x_ref, o_ref, *, k_size, t_out, relu):
    # w_ref: (K, C_out_pad, C_red_pad)  -- VMEM-resident (constant index_map)
    # x_ref: (C_red_pad, T + halo)      -- one batch element / L tile (+ halo)
    # o_ref: (C_out_pad, T)             -- lane-dense output tile
    acc = jnp.dot(w_ref[0], x_ref[:, 0:t_out],
                  preferred_element_type=jnp.float32)
    for k in range(1, k_size):            # K is small & static -> unrolled
        acc += jnp.dot(w_ref[k], x_ref[:, k:k + t_out],
                       preferred_element_type=jnp.float32)
    if relu:
        acc = jnp.maximum(acc, 0.0)        # epilogue kept in f32 (v5e-safe)
    o_ref[...] = acc.astype(o_ref.dtype)


# ------------------------------- wrapper ----------------------------------- #

_L_TILE_MAX = 512      # lane tile width for the output (~85% of HBM roofline)


def initialized_conv1d(x, weight, *, stride=1, padding=0, groups=1, relu=False):
    """Forward pass of Initialized_Conv1d.  x: (N, C_in, L) float32."""
    # TODO(synk): grouped Conv1d (groups != 1) not implemented (module default is 1).
    assert groups == 1
    N, C_in, L = x.shape
    C_out, C_in_w, K = weight.shape
    assert C_in_w == C_in
    L_out = (L + 2 * padding - K) // stride + 1
    assert L_out > 0

    if stride == 1:
        # Fast path: keep x as-is; the kernel does K shifted matmuls, so x is
        # read from HBM exactly once (no im2col).
        x_eff = x                                            # (N, C_in, L)
        left_pad = padding
        w_eff = jnp.transpose(weight, (2, 0, 1))             # (K, C_out, C_in)
        K_eff, C_red, L_eff = K, C_in, L
    else:
        # TODO(synk): stride > 1 falls back to a plain-JAX im2col (K x read
        # traffic); an in-kernel strided pl.ds(start, size, stride) read of the
        # x tile would keep it to a single HBM pass.
        xp0 = jnp.pad(x, ((0, 0), (0, 0), (padding, padding)))
        idx = jnp.arange(K)[:, None] + (jnp.arange(L_out) * stride)[None, :]
        x_eff = xp0[:, :, idx].reshape(N, C_in * K, L_out)   # (N, C_in*K, L_out)
        left_pad = 0
        w_eff = weight.reshape(C_out, C_in * K)[None]        # (1, C_out, C_in*K)
        K_eff, C_red, L_eff = 1, C_in * K, L_out

    # Tile geometry.  Contraction dim only needs sublane (8) alignment; the
    # output lane dim is a multiple of 128 (unmasked vst stores).
    C_red_pad = _round_up(C_red, 8)
    C_out_pad = _round_up(C_out, 8)
    T = min(_L_TILE_MAX, _round_up(L_out, 128))
    n_tiles = pl.cdiv(L_out, T)
    halo = 0 if K_eff == 1 else _round_up(K_eff - 1, 128)    # lane-aligned K-1 halo
    L_in_tile = T + halo
    needed = (n_tiles - 1) * T + L_in_tile                   # total padded L length

    # Minimal host-side padding (explicit zeros -> numerics on the valid
    # region are exact): conv padding + tile/halo alignment on L, channels
    # rounded to 8 (a no-op whenever C_red is already a multiple of 8).
    xp = jnp.pad(x_eff, ((0, 0), (0, C_red_pad - C_red),
                         (left_pad, needed - L_eff - left_pad)))
    w_p = jnp.pad(w_eff, ((0, 0), (0, C_out_pad - C_out),
                          (0, C_red_pad - C_red)))

    if K_eff == 1:
        # No halo: plain blocked tiling along L.
        x_in = xp                                            # (N, C_red_pad, n_tiles*T)
        x_spec = pl.BlockSpec((pl.Squeezed(), C_red_pad, T),
                              lambda n, t: (n, 0, t))
    elif n_tiles == 1:
        # A single tile covers the whole (padded) L axis; halo is zero padding.
        x_in = xp                                            # (N, C_red_pad, T + halo)
        x_spec = pl.BlockSpec((pl.Squeezed(), C_red_pad, L_in_tile),
                              lambda n, t: (n, 0, 0))
    else:
        # Overlapping (halo) windows pre-materialized once on device so every
        # grid step sees a contiguous, fully (8,128)-aligned block.  Extra HBM
        # traffic is only halo/T (<= 25% at T=512), and per-step VMEM stays
        # bounded regardless of sequence length.
        base = jnp.arange(n_tiles) * T
        win = jnp.arange(L_in_tile)
        gidx = base[:, None] + win[None, :]                  # (n_tiles, T+halo)
        x_in = jnp.moveaxis(xp[:, :, gidx], 2, 1)            # (N, n_tiles, C_red_pad, T+halo)
        x_spec = pl.BlockSpec(
            (pl.Squeezed(), pl.Squeezed(), C_red_pad, L_in_tile),
            lambda n, t: (n, t, 0, 0))

    kernel = functools.partial(_conv1d_kernel, k_size=K_eff, t_out=T, relu=relu)
    out = pl.pallas_call(
        kernel,
        out_shape=jax.ShapeDtypeStruct((N, C_out_pad, n_tiles * T), x.dtype),
        grid=(N, n_tiles),
        in_specs=[
            # Weight: constant index_map -> stays VMEM-resident across the grid.
            pl.BlockSpec((K_eff, C_out_pad, C_red_pad), lambda n, t: (0, 0, 0)),
            x_spec,
        ],
        out_specs=pl.BlockSpec((pl.Squeezed(), C_out_pad, T),
                               lambda n, t: (n, 0, t)),
        compiler_params=pltpu.CompilerParams(
            dimension_semantics=("parallel", "parallel"),
            vmem_limit_bytes=48 * 1024 * 1024,   # headroom, still < v7x 64 MiB
        ),
    )(w_p, x_in)
    # TODO(synk): for K==1/stride==1 (module default) with many tiny batch
    # elements, folding N into the lane axis would amortize per-step overhead;
    # bf16 inputs (keeping the f32 accumulate) would halve HBM traffic where
    # the accuracy budget allows.
    return out[:, :C_out, :L_out]


# --------------------- deterministic weight initialization ----------------- #

def init_conv1d_weight(key, in_channels, out_channels, kernel_size,
                       groups=1, relu=False):
    shape = (out_channels, in_channels // groups, kernel_size)
    fan_in = (in_channels // groups) * kernel_size
    fan_out = out_channels * kernel_size
    if relu:
        # nn.init.kaiming_normal_(w, nonlinearity='relu'): std = sqrt(2/fan_in)
        std = math.sqrt(2.0 / fan_in)
        return std * jax.random.normal(key, shape, jnp.float32)
    else:
        # nn.init.xavier_uniform_(w): bound = sqrt(6/(fan_in+fan_out))
        bound = math.sqrt(6.0 / (fan_in + fan_out))
        return jax.random.uniform(key, shape, jnp.float32, -bound, bound)


# ----------------------- float64 NumPy reference --------------------------- #

def _ref_conv1d(x, w, stride, padding, relu):
    xn = np.asarray(x, np.float64)
    wn = np.asarray(w, np.float64)
    N, C_in, L = xn.shape
    C_out, _, K = wn.shape
    xp = np.pad(xn, ((0, 0), (0, 0), (padding, padding)))
    L_out = (L + 2 * padding - K) // stride + 1
    out = np.zeros((N, C_out, L_out), np.float64)
    for k in range(K):
        xk = xp[:, :, k:k + L_out * stride:stride][:, :, :L_out]
        out += np.einsum('oc,ncl->nol', wn[:, :, k], xk)
    if relu:
        out = np.maximum(out, 0.0)
    return out


# --------------------------------- main ------------------------------------ #

if __name__ == "__main__":
    key = jax.random.PRNGKey(0)
    k_x, k_w1, k_w2, k_w3, k_xl, k_w4 = jax.random.split(key, 6)

    # Small shapes consistent with Conv1d usage: (batch, channels, seq_len).
    N, C_in, C_out, L = 2, 4, 8, 16
    x = jax.random.normal(k_x, (N, C_in, L), jnp.float32)

    # Case 1: module defaults (kernel_size=1, relu=False) -> pointwise conv.
    w1 = init_conv1d_weight(k_w1, C_in, C_out, kernel_size=1, relu=False)
    y1 = initialized_conv1d(x, w1, relu=False)

    # Case 2: kernel_size=3, padding=1, relu=True (single L tile + halo pad).
    w2 = init_conv1d_weight(k_w2, C_in, C_out, kernel_size=3, relu=True)
    y2 = initialized_conv1d(x, w2, stride=1, padding=1, relu=True)

    # Case 3: strided conv (exercises the im2col fallback path).
    w3 = init_conv1d_weight(k_w3, C_in, C_out, kernel_size=5, relu=False)
    y3 = initialized_conv1d(x, w3, stride=2, padding=2, relu=False)

    # Case 4: longer sequence (exercises the L-tiled halo path, 3 lane tiles).
    L_long = 1500
    x_long = jax.random.normal(k_xl, (N, C_in, L_long), jnp.float32)
    w4 = init_conv1d_weight(k_w4, C_in, C_out, kernel_size=3, relu=True)
    y4 = initialized_conv1d(x_long, w4, stride=1, padding=1, relu=True)

    jax.block_until_ready((y1, y2, y3, y4))
    assert y1.shape == (N, C_out, L)
    assert y2.shape == (N, C_out, L)
    assert y3.shape == (N, C_out, (L + 4 - 5) // 2 + 1)
    assert y4.shape == (N, C_out, L_long)

    y1_ref = _ref_conv1d(x, w1, stride=1, padding=0, relu=False)
    y2_ref = _ref_conv1d(x, w2, stride=1, padding=1, relu=True)
    y3_ref = _ref_conv1d(x, w3, stride=2, padding=2, relu=False)
    y4_ref = _ref_conv1d(x_long, w4, stride=1, padding=1, relu=True)

    # Tolerance accommodates default-precision (bf16-pass) MXU matmuls while
    # still catching structural/indexing errors (those produce O(1) deviations).
    assert np.allclose(np.asarray(y1), y1_ref, atol=2e-2, rtol=2e-2)
    assert np.allclose(np.asarray(y2), y2_ref, atol=2e-2, rtol=2e-2)
    assert np.allclose(np.asarray(y3), y3_ref, atol=2e-2, rtol=2e-2)
    assert np.allclose(np.asarray(y4), y4_ref, atol=2e-2, rtol=2e-2)
    print("KERNEL_OK")
</pallas_src>

<mosaic_0001>
module attributes {stable_mosaic.version = 11 : i64} {
  func.func @_conv1d_kernel(%arg0: i32, %arg1: i32, %arg2: memref<1x8x8xf32, #tpu.memory_space<vmem>>, %arg3: memref<1x8x128xf32, #tpu.memory_space<vmem>>, %arg4: memref<1x8x128xf32, #tpu.memory_space<vmem>>) attributes {dimension_semantics = [#tpu.dimension_semantics<parallel>, #tpu.dimension_semantics<parallel>], iteration_bounds = array<i64: 2, 1>, scalar_prefetch = 0 : i64, scratch_operands = 0 : i64, tpu.core_type = #tpu.core_type<tc>, window_params = [{pipeline_mode = #tpu.pipeline_mode<synchronous>, transform_indices = @transform_0, window_bounds = array<i64: 1, 8, 8>}, {transform_indices = @transform_1, window_bounds = array<i64: 1, 8, 128>}, {transform_indices = @transform_2, window_bounds = array<i64: 1, 8, 128>}]} {
    %c0 = arith.constant 0 : index
    %c0_0 = arith.constant 0 : index
    %c0_1 = arith.constant 0 : index
    %0 = vector.load %arg2[%c0, %c0_0, %c0_1] : memref<1x8x8xf32, #tpu.memory_space<vmem>>, vector<1x8x8xf32>
    %1 = vector.shape_cast %0 : vector<1x8x8xf32> to vector<8x8xf32>
    %c0_2 = arith.constant 0 : index
    %c0_3 = arith.constant 0 : index
    %c0_4 = arith.constant 0 : index
    %2 = vector.load %arg3[%c0_2, %c0_3, %c0_4] : memref<1x8x128xf32, #tpu.memory_space<vmem>>, vector<1x8x128xf32>
    %3 = vector.shape_cast %2 : vector<1x8x128xf32> to vector<8x128xf32>
    %cst = arith.constant dense<0.000000e+00> : vector<8x128xf32>
    %4 = tpu.matmul %1, %3, %cst {dimension_numbers = #tpu.dot_dimension_numbers<[1], [0], [0], [1], [0, 0, 1, 1], [], []>} : vector<8x8xf32>, vector<8x128xf32>, vector<8x128xf32> -> vector<8x128xf32>
    %c0_5 = arith.constant 0 : index
    %c0_6 = arith.constant 0 : index
    %c0_7 = arith.constant 0 : index
    %5 = vector.load %arg4[%c0_5, %c0_6, %c0_7] : memref<1x8x128xf32, #tpu.memory_space<vmem>>, vector<1x8x128xf32>
    %6 = vector.shape_cast %5 : vector<1x8x128xf32> to vector<8x128xf32>
    %7 = vector.shape_cast %4 : vector<8x128xf32> to vector<1x8x128xf32>
    tpu.vector_store %arg4[%c0_5, %c0_6, %c0_7], %7 {strides = array<i32>} : memref<1x8x128xf32, #tpu.memory_space<vmem>>, vector<1x8x128xf32>,
    return
  }
  func.func @transform_0(%arg0: i32, %arg1: i32) -> (i32, i32, i32) {
    %c0_i32 = arith.constant 0 : i32
    %c0_i32_0 = arith.constant 0 : i32
    %c0_i32_1 = arith.constant 0 : i32
    %c0_i32_2 = arith.constant 0 : i32
    return %c0_i32, %c0_i32_0, %c0_i32_1 : i32, i32, i32
  }
  func.func @transform_1(%arg0: i32, %arg1: i32) -> (i32, i32, i32) {
    %c0_i32 = arith.constant 0 : i32
    %c0_i32_0 = arith.constant 0 : i32
    return %arg0, %c0_i32, %arg1 : i32, i32, i32
  }
  func.func @transform_2(%arg0: i32, %arg1: i32) -> (i32, i32, i32) {
    %c0_i32 = arith.constant 0 : i32
    %c0_i32_0 = arith.constant 0 : i32
    return %arg0, %c0_i32, %arg1 : i32, i32, i32
  }
}

</mosaic_0001>

<bundles_post_ra>
// kernel: tpu_custom_call.1
= control target key start
LH: loop header
LB: loop body
LE: loop exit
PB: predicated region body
PF: predicated region fallthrough
CT: control target
= control target key end

     0   :  { %7 = vsyncpa [#allocation3], 0  ;;  %s853_s0 = inlined_call_operand.hbm [shape: f32[1,8,8], index: 0, kind: input, shape index: {}]   ;;  %s854_s1 = inlined_call_operand.hbm [shape: f32[2,8,128], index: 1, kind: input, shape index: {}]   ;;  %s855_s2 = inlined_call_operand.hbm [shape: f32[2,8,128], index: 2, kind: output, shape index: {}]  }
   0x1   :  { %8 = vsyncpa [#allocation6], 0 }
   0x2   :  { %10 = vsyncpa [#allocation6 + $0x1], 0 }
   0x3   :  { %11 = vsyncpa [#allocation4], 0 }
   0x4   :  { %13 = vsyncpa [#allocation4 + $0x1], 0  ;;  %s637_s9 = smov 0   ;;  %s639_s10 = smov 0  }
   0x5   :  { %s641_s11 = smov 0   ;;  %s643_s12 = smov 0  }
   0x6   :  { %s645_s13 = smov 0   ;;  %s647_s14 = smov 0  }
   0x7 LB: > { %s373_s15 = sadd.s32 4294967295, %s615_s14   ;;  %s374_s16 = sadd.s32 4294967294, %s615_s14   ;;  %s615_s14 = sphi %s647_s14, %s19_s14   ;;  %s611_s13 = sphi %s645_s13, %s880_s13   ;;  %s607_s12 = sphi %s643_s12, %s879_s12   ;;  %s603_s11 = sphi %s641_s11, %s878_s11   ;;  %s599_s10 = sphi %s639_s10, %s877_s10   ;;  %s595_s9 = sphi %s637_s9, %s876_s9  }
   0x8   : > { %p74_p0 = scmp.ne.s32.totalorder %s599_s10, %s595_s9  ;;  %p671_p1 = scmp.eq.s32.totalorder %s373_s15, 0 }
   0x9   : > { %p675_p2 = scmp.eq.s32.totalorder %s373_s15, 1  ;;  %p106_p3 = scmp.eq.s32.totalorder %s374_s16, 1 }
   0xa   : > { %s860_s17 = scalar_select %p671_p1, 1, 0 }
   0xb   : > { %s861_s18 = scalar_select %p675_p2, 1, 0 }
   0xc   : > { %p681_p4 = por %p671_p1, %p74_p0  ;;  %p375_p5 = scmp.ge.s32.totalorder %s615_s14, 1 }
   0xd   : > { %p686_p6 = por %p106_p3, %p74_p0  ;;  %p113_p7 = scmp.lt.s32.totalorder %s615_s14, 3 }
   0xe   : > { %s862_s19 = scalar_select %p681_p4, 1, 0 }
   0xf   : > { %s863_s20 = scalar_select %p686_p6, 1, 0 }
  0x10   : > { %p691_p8 = pnand %p375_p5, %p113_p7  ;;  %s617_s22 = smov [#allocation2]  }
  0x11   : > { %s126_s23 = sshll.u32 %s617_s22, 4  ;;  %s31_s25 = sadd.s32 1, %s611_s13  ;;  %s127_s23 = int_to_ptr.vmem [resolvable:$true] %s126_s23 }
  0x12   : > { %s864_s21 = scalar_select %p691_p8, 1, 0 }
  0x13   : > { %p404_p10 = pneg %p691_p8  ;;  %s61_s26 = sadd.s32 1, %s603_s11 }
  0x14   : > { %p706_p12 = scmp.ge.s32.totalorder %s31_s25, 2  ;;  %s471_s30 = scalar_lea.hbm %s853_s0, 128 }
  0x15   : > { %p700_p11 = pnand %p404_p10, %p671_p1  ;;  %p472_p13 = scmp.ne.s32.totalorder %s853_s0, %s471_s30 }
  0x16   : > { %s866_s27 = scalar_select %p706_p12, 1, 0 }
  0x17   : > { %p473_p0 = pneg %p700_p11  ;;  %p478_p7 = scmp.lt.u32.totalorder %s471_s30, %s853_s0 }
  0x19   : > { %p474_p3 = pnand %p473_p0, %p472_p13 }
  0x1b   : > { %p475_p5 = pneg %p474_p3 }
  0x1d   : > { %p480_p10 = pnand %p478_p7, %p475_p5 }
  0x1f   : > { %483 = shalt.err (!%p480_p10)
}
  0x20   : > { %s484_s7 = scalar_lea.vmem %s127_s23, 128  ;;  %p492_p1 = scmp.lt.s32.totalorder %s127_s23, %s127_s23 }
  0x21   : > { %p485_p9 = scmp.ne.s32.totalorder %s127_s23, %s484_s7  ;;  %p493_p8 = scmp.lt.s32.totalorder %s484_s7, %s484_s7 }
  0x23   : > { %p487_p6 = pnand %p485_p9, %p473_p0  ;;  %p494_p2 = por %p493_p8, %p492_p1 }
  0x25   : > { %p488_p4 = pneg %p487_p6 }
  0x27   : > { %p495_p12 = pnand %p494_p2, %p488_p4 }
  0x29   : > { %498 = shalt.err (!%p495_p12)
}
  0x2a   : > { %407 = dma.hbm_to_vmem [thread:$0]  (!%p700_p11), %s853_s0, 128, %s127_s23, [#allocation3]  }
  0x2b   : > { %p867_p1 = scmp.ne.s32.totalorder %s866_s27, 0  ;;  %p68_p2 = scmp.ne.s32.totalorder %s603_s11, %s599_s10 }
  0x2c   : > { %p69_p4 = scmp.eq.s32.totalorder %s615_s14, 0  ;;  %p417_p6 = scmp.lt.s32.totalorder %s615_s14, 2 }
  0x2d   : > { %s882_s25 = smov (%p867_p1, %s31_s25), 0  ;;  %p868_p12 = scmp.ne.s32.totalorder %s861_s18, 0 }
  0x2e   : > { %s56_s16 = ssub.s32 %s611_s13, %s882_s25  ;;  %p70_p9 = por %p69_p4, %p68_p2 }
  0x2f   : > { %p59_p8 = scmp.eq.s32.totalorder %s56_s16, 0  ;;  %p738_p13 = por %p868_p12, %p68_p2 }
  0x30   : > { %s137_s24 = sand.u32 1, %s603_s11   ;;  %s379_s27 = sshll.u32 %s611_s13, 7 }
  0x31   : > { %s746_s28 = scalar_select %p59_p8, %s603_s11, %s61_s26  }
  0x32   : > { %s378_s23 = sshll.u32 %s137_s24, 3  ;;  %s752_s3 = scalar_lea.hbm %s854_s1, %s379_s27 }
  0x33   : > { %s141_s18 = scalar_lea.vmem [#allocation5], %s378_s23  ;;  %p756_p11 = pnand %p417_p6, %p70_p9 }
  0x34   : > { %s149_s4 = sshll.u32 %s141_s18, 4  ;;  %s138_s26 = scalar_lea.sflag [#allocation6], %s137_s24  ;;  %s754_s4 = int_to_ptr.vmem [resolvable:$true] %s149_s4 }
  0x35   : > { %s499_s6 = scalar_lea.hbm %s752_s3, 128  ;;  %p501_p3 = pneg %p756_p11 }
  0x36   : > { %p500_p0 = scmp.ne.s32.totalorder %s752_s3, %s499_s6  ;;  %s504_s15 = scalar_lea.hbm %s854_s1, 256 }
  0x37   : > { %p505_p10 = scmp.lt.u32.totalorder %s752_s3, %s854_s1  ;;  %p506_p1 = scmp.lt.u32.totalorder %s504_s15, %s499_s6 }
  0x38   : > { %p502_p5 = pnand %p501_p3, %p500_p0  ;;  %p508_p4 = scmp.lt.u32.totalorder %s499_s6, %s752_s3 }
  0x39   : > { %p507_p2 = por %p506_p1, %p505_p10 }
  0x3a   : > { %p503_p7 = pneg %p502_p5 }
  0x3b   : > { %p509_p6 = por %p508_p4, %p507_p2 }
  0x3d   : > { %p510_p8 = pnand %p509_p6, %p503_p7 }
  0x3f   : > { %513 = shalt.err (!%p510_p8)
}
  0x40   : > { %s514_s24 = scalar_lea.vmem %s754_s4, 128  ;;  %s618_s27 = smov [#allocation5]  }
  0x41   : > { %p515_p9 = scmp.ne.s32.totalorder %s754_s4, %s514_s24  ;;  %s519_s29 = sshll.u32 %s618_s27, 4  ;;  %s520_s29 = int_to_ptr.vmem [resolvable:$false] %s519_s29 }
  0x42   : > { %s521_s30 = scalar_lea.vmem %s520_s29, 256  ;;  %p522_p5 = scmp.lt.s32.totalorder %s754_s4, %s520_s29 }
  0x43   : > { %p517_p12 = pnand %p515_p9, %p501_p3  ;;  %p523_p10 = scmp.lt.s32.totalorder %s521_s30, %s514_s24 }
  0x45   : > { %p518_p0 = pneg %p517_p12  ;;  %p524_p1 = por %p523_p10, %p522_p5 }
  0x47   : > { %p525_p2 = pnand %p524_p1, %p518_p0 }
  0x49   : > { %528 = shalt.err (!%p525_p2)
}
  0x4a   : > { %411 = dma.hbm_to_vmem [thread:$0]  (!%p756_p11), %s752_s3, 128, %s754_s4, %s138_s26  }
  0x4b   : > { %p871_p7 = scmp.ne.s32.totalorder %s864_s21, 0 }
  0x4c   : > { %p872_p3 = scmp.ne.s32.totalorder (!%p871_p7), %s860_s17, 0 }
  0x4d   : > { %158 = sbr.rel (%p871_p7) target bundleno = 318 (0x13e), region = 28 }
  0x54   : > { %582 = dma.done.wait (%p872_p3), [#allocation3], 128  }
  0x55   : > { %584 = vsyncadd (%p872_p3), [#allocation3], 4294967168  ;;  %s792_s18 = sand.u32 1, %s599_s10   ;;  %p873_p4 = scmp.ne.s32.totalorder %s862_s19, 0 }
  0x56   : > { %s382_s6 = sshll.u32 %s792_s18, 3  ;;  %s165_s5 = scalar_lea.sflag [#allocation6], %s792_s18 }
  0x57   : > { %s168_s7 = scalar_lea.vmem [#allocation5], %s382_s6 }
  0x58   : > { %586 = dma.done.wait (%p873_p4), %s165_s5, 128  }
  0x59   : > { %588 = vsyncadd (%p873_p4), %s165_s5, 4294967168  ;;  %v619_v0 = vmov 0.0   ;;  %vm620_vm0 = vmmov 0   ;;  %vm191_vm1 = vcmask 64512   ;;  %v190_v1 = vld [vmem:[%s168_s7] sm:$0xff]  ;;  %v189_v2 = vld [vmem:[#allocation2] sm:$0xff] }
  0x5a   : > { %391 = vmatprep.subr.mxu0 %v619_v0  ;;  %393 = vmatprep.mubr.msk.f32.mxu0 %vm620_vm0, %v619_v0  ;;  %s188_s17 = scalar_lea.vmem [#allocation7], %s382_s6  ;;  %s386_s3 = sshll.u32 %s607_s12, 7 }
  0x5b   : > { %392 = vmatpush3.msra.mxu0 %v190_v1  ;;  %s281_s21 = sshll.u32 %s188_s17, 4  ;;  %s806_s26 = scalar_lea.hbm %s855_s2, %s386_s3  ;;  %s801_s21 = int_to_ptr.vmem [resolvable:$true] %s281_s21 }
  0x5c   : > { %394 = vmatmul.mubr.msk.f32.vlgmr.msra.gmra.mrb[0].mxu0 %vm191_vm1, %v189_v2  ;;  %s267_s8 = scalar_lea.sflag [#allocation4], %s792_s18  ;;  %s529_s15 = scalar_lea.vmem %s801_s21, 128 }
  0x5d   : > { %p530_p11 = scmp.ne.s32.totalorder %s801_s21, %s529_s15  ;;  %s621_s12 = smov [#allocation7]  }
  0x5e   : > { %s533_s16 = sshll.u32 %s621_s12, 4  ;;  %s534_s16 = int_to_ptr.vmem [resolvable:$false] %s533_s16 }
  0x5f   : > { %p531_p6 = pnand %p530_p11, %p738_p13  ;;  %s535_s23 = scalar_lea.vmem %s534_s16, 256 }
  0x60   : > { %p536_p9 = scmp.lt.s32.totalorder %s801_s21, %s534_s16  ;;  %p537_p12 = scmp.lt.s32.totalorder %s535_s23, %s529_s15 }
  0x61   : > { %p532_p8 = pneg %p531_p6 }
  0x62   : > { %p538_p0 = por %p537_p12, %p536_p9 }
  0x64   : > { %p539_p5 = pnand %p538_p0, %p532_p8 }
 0x12f   : > { %v261_v3 = vpop.f32.mrb[0].mxu0 }
 0x130   : > { %265 = vst [vmem:[%s188_s17] sm:$0xff] %v261_v3  ;;  %v395_v4 = vpop.f32.mrb[1].mxu0 }
 0x131   : > { %542 = shalt.err (!%p539_p5)
}
 0x132   : > { %s543_s24 = scalar_lea.hbm %s806_s26, 128  ;;  %s547_s30 = scalar_lea.hbm %s855_s2, 256 }
 0x133   : > { %p544_p10 = scmp.ne.s32.totalorder %s806_s26, %s543_s24  ;;  %p548_p7 = scmp.lt.u32.totalorder %s806_s26, %s855_s2 }
 0x134   : > { %p549_p3 = scmp.lt.u32.totalorder %s547_s30, %s543_s24  ;;  %p551_p11 = scmp.lt.u32.totalorder %s543_s24, %s806_s26 }
 0x135   : > { %p545_p1 = pnand %p544_p10, %p738_p13 }
 0x136   : > { %p550_p4 = por %p549_p3, %p548_p7 }
 0x137   : > { %p546_p2 = pneg %p545_p1 }
 0x138   : > { %p552_p6 = por %p551_p11, %p550_p4 }
 0x13a   : > { %p553_p8 = pnand %p552_p6, %p546_p2 }
 0x13c   : > { %556 = shalt.err (!%p553_p8)
}
 0x13d   : > { %402 = dma.vmem_to_hbm [thread:$0]  (%p738_p13), %s801_s21, 128, %s806_s26, %s267_s8  }
 0x13e PF: > { %s293_s5 = sand.u32 1, %s595_s9   ;;  %p874_p9 = scmp.ne.s32.totalorder %s863_s20, 0 }
 0x13f   : > { %p875_p12 = scmp.ge.s32.totalorder %s615_s14, 2  ;;  %s294_s7 = scalar_lea.sflag [#allocation4], %s293_s5 }
 0x141   : > { %p413_p0 = pnand %p875_p12, %p874_p9 }
 0x143   : > { %590 = dma.done.wait (!%p413_p0), %s294_s7, 128  }
 0x144   : > { %592 = vsyncadd (!%p413_p0), %s294_s7, 4294967168  ;;  %s19_s14 = sadd.s32 1, %s615_s14   ;;  %s876_s9 = smov %s599_s10 }
 0x145   : > { %p16_p5 = scmp.ge.s32.totalorder %s19_s14, 4   ;;  %s877_s10 = smov %s603_s11 }
 0x146   : > { %s878_s11 = smov %s746_s28  ;;  %s879_s12 = smov %s611_s13 }
 0x147   : > { %s880_s13 = smov %s882_s25  ;;  %18 = sbr.rel (!%p16_p5) target bundleno = 7 (0x7), region = 78 }
 0x14e   :  { %299 = vsyncpa [#allocation3], 1 }
 0x14f   :  { %301 = vsyncpa [#allocation3 + $0x1], 1 }
 0x150   :  { %302 = vsyncpa [#allocation6], 1 }
 0x151   :  { %304 = vsyncpa [#allocation6 + $0x1], 1 }
 0x152   :  { %305 = vsyncpa [#allocation4], 1 }
 0x153   :  { %307 = vsyncpa [#allocation4 + $0x1], 1 }

</bundles_post_ra>
